<compile_context>
chip_gen: v7x
topology: tpu7x:2x2x1
jax: 0.10.0
libtpu: 0.0.40
codegen_flags: <defaults>
</compile_context>

<pallas_src>
import functools

import jax
import jax.numpy as jnp
from jax.experimental import pallas as pl
from jax.experimental.pallas import tpu as pltpu


_TV_TARGET = 512                  # vocab rows per one-hot/MXU pass inside the kernel
_GATHER_ROWS_PER_STEP = 128       # row DMAs kept in flight per grid step (gather path)


def _round_up(x, m):
    return ((x + m - 1) // m) * m


def _device_kind():
    try:
        return jax.devices()[0].device_kind.lower()
    except Exception:
        return ""


def _is_v7():
    k = _device_kind()
    return ("v7" in k) or ("tpu7" in k)


def _preferred_tm():
    """MXU row count per TPU generation: 128 (v2-v5), 256 (v6e / v7x)."""
    k = _device_kind()
    for tag in ("v2", "v3", "v4", "v5"):
        if tag in k:
            return 128
    return 256


def _matmul_table_budget_bytes():
    # Resident-table budget (the pipeline may double-buffer it): v7x has only
    # 64 MiB physical VMEM per TensorCore vs 128 MiB on v5e/v6e.
    return (12 << 20) if _is_v7() else (24 << 20)


def _padded_table_dims(v, es):
    """(v_pad, es_pad, tv) used by the matmul path for a [v, es] table."""
    es_pad = _round_up(es, 128)
    v_pad = _round_up(v, 8)
    tv = min(_TV_TARGET, v_pad)
    v_pad = _round_up(v_pad, tv)
    return v_pad, es_pad, tv


def pad_table_for_lookup(table):
    """Pad a [V, es] table once (at init) so forward calls never pad it again."""
    v, es = table.shape
    v_pad, es_pad, _ = _padded_table_dims(v, es)
    if (v_pad, es_pad) == (v, es):
        return table
    return jnp.pad(table, ((0, v_pad - v), (0, es_pad - es)))


# --------------------------------------------------------------------------
# Path 1: one-hot matmul gather (small tables), table resident in VMEM.
# --------------------------------------------------------------------------
def _onehot_matmul_kernel(idx_ref, table_ref, out_ref, *, tv):
    # idx_ref:   [TM, 1]          int32  (block of flattened lookup indices)
    # table_ref: [V_pad, es_pad]  table  (resident: constant index_map -> one DMA)
    # out_ref:   [TM, es_pad]
    tm, es_pad = out_ref.shape
    v_pad = table_ref.shape[0]
    nblk = v_pad // tv

    idx = idx_ref[...]                                          # [TM, 1]
    # Iota built once; the per-block offset is applied on the [TM,1] index
    # vector (cheap) instead of on the [TM,TV] iota (expensive VALU work).
    iota = jax.lax.broadcasted_iota(jnp.int32, (tm, tv), 1)     # [TM, TV]

    def block(k_off, table_block, acc):
        # NOTE: out-of-range / negative indices silently yield all-zero rows
        # (no iota match), whereas torch.nn.Embedding would raise.
        onehot = (iota == (idx - k_off)).astype(table_block.dtype)
        return acc + jnp.dot(onehot, table_block,
                             preferred_element_type=jnp.float32)

    acc = jnp.zeros((tm, es_pad), jnp.float32)
    if nblk <= 16:
        # Static unroll: slices are compile-time constants.
        for k in range(nblk):
            acc = block(k * tv, table_ref[pl.ds(k * tv, tv), :], acc)
    else:
        def body(k, acc):
            start = pl.multiple_of(k * tv, tv)
            return block(k * tv, table_ref[pl.ds(start, tv), :], acc)
        acc = jax.lax.fori_loop(0, nblk, body, acc)

    out_ref[...] = acc.astype(out_ref.dtype)


# --------------------------------------------------------------------------
# Path 2: data-dependent DMA row gather (large tables), table stays in HBM.
# --------------------------------------------------------------------------
def _dma_gather_kernel(idx_ref, table_hbm, out_ref, sems):
    # idx_ref:   SMEM int32 [M_pad]   (scalar-prefetched flat indices)
    # table_hbm: HBM  [V, es_pad]     (memory_space=pl.ANY, no auto-DMA)
    # out_ref:   VMEM [TG, es_pad]    (pipelined output block, DMA'd into directly)
    # sems:      DMA semaphores (TG,)
    i = pl.program_id(0)
    tg = out_ref.shape[0]
    base = i * tg
    copies = []
    for j in range(tg):                      # static unroll: TG row DMAs in flight
        row = idx_ref[base + j]
        cp = pltpu.make_async_copy(table_hbm.at[row], out_ref.at[j], sems.at[j])
        cp.start()
        copies.append(cp)
    for cp in copies:
        cp.wait()


def embedding_lookup(table, idx, *, method="auto", out_dim=None):
    """Gather rows of `table` ([V, es]) at integer indices `idx` (any shape).

    `table` may be pre-padded with `pad_table_for_lookup` (no copy is made in
    that case).  Returns idx.shape + (out_dim,) where out_dim defaults to es.
    """
    orig_shape = idx.shape
    flat = idx.reshape(-1).astype(jnp.int32)
    m = int(flat.shape[0])
    v, es = table.shape
    if out_dim is None:
        out_dim = es
    dtype = table.dtype
    itemsize = jnp.dtype(dtype).itemsize
    v_pad, es_pad, tv = _padded_table_dims(v, es)

    if method == "auto":
        table_bytes = v_pad * es_pad * itemsize
        method = "matmul" if table_bytes <= _matmul_table_budget_bytes() else "gather"

    if method == "matmul":
        tm = min(_preferred_tm(), _round_up(m, 8))
        m_pad = _round_up(m, tm)
        if (v_pad, es_pad) != table.shape:       # only pads if caller didn't pre-pad
            table_p = jnp.pad(table, ((0, v_pad - v), (0, es_pad - es)))
        else:
            table_p = table
        idx_p = jnp.pad(flat, (0, m_pad - m)).reshape(m_pad, 1)
        grid = (m_pad // tm,)

        table_bytes = v_pad * es_pad * itemsize
        vmem_needed = (2 * table_bytes                 # resident table (+ spare buffer)
                       + 4 * tm * es_pad * 4           # output block x2 + accumulator
                       + tm * tv * 4                   # one-hot working tile
                       + (4 << 20))                    # slack
        vmem_limit = max(32 << 20, vmem_needed)
        vmem_limit = min(vmem_limit, (56 << 20) if _is_v7() else (100 << 20))

        cost = pl.CostEstimate(
            flops=2 * m_pad * v_pad * es_pad,
            transcendentals=0,
            bytes_accessed=(m_pad * 4
                            + v_pad * es_pad * itemsize        # table fetched once
                            + m_pad * es_pad * itemsize),
        )
        out = pl.pallas_call(
            functools.partial(_onehot_matmul_kernel, tv=tv),
            out_shape=jax.ShapeDtypeStruct((m_pad, es_pad), dtype),
            grid_spec=pltpu.PrefetchScalarGridSpec(
                num_scalar_prefetch=0,
                grid=grid,
                in_specs=[
                    pl.BlockSpec((tm, 1), lambda i: (i, 0)),            # index block
                    pl.BlockSpec((v_pad, es_pad), lambda i: (0, 0)),    # resident table
                ],
                out_specs=pl.BlockSpec((tm, es_pad), lambda i: (i, 0)),
            ),
            compiler_params=pltpu.CompilerParams(
                dimension_semantics=("parallel",),
                vmem_limit_bytes=int(vmem_limit),
            ),
            cost_estimate=cost,
        )(idx_p, table_p)

    elif method == "gather":
        tg = min(_GATHER_ROWS_PER_STEP, _round_up(m, 8))
        m_pad = _round_up(m, tg)
        if es_pad != es:                          # only pads if caller didn't pre-pad
            table_p = jnp.pad(table, ((0, 0), (0, es_pad - es)))
        else:
            table_p = table
        # Clamp so a bad index can never issue an out-of-range HBM DMA
        # (torch.nn.Embedding would raise instead).
        flat_c = jnp.clip(flat, 0, v - 1)
        idx_p = jnp.pad(flat_c, (0, m_pad - m))

        cost = pl.CostEstimate(
            flops=0,
            transcendentals=0,
            bytes_accessed=m_pad * 4 + 2 * m_pad * es_pad * itemsize,
        )
        out = pl.pallas_call(
            _dma_gather_kernel,
            out_shape=jax.ShapeDtypeStruct((m_pad, es_pad), dtype),
            grid_spec=pltpu.PrefetchScalarGridSpec(
                num_scalar_prefetch=1,                      # flat indices -> SMEM
                grid=(m_pad // tg,),
                in_specs=[pl.BlockSpec(memory_space=pl.ANY)],   # table stays in HBM
                out_specs=pl.BlockSpec((tg, es_pad), lambda i, idx_pref: (i, 0)),
                scratch_shapes=[pltpu.SemaphoreType.DMA((tg,))],
            ),
            compiler_params=pltpu.CompilerParams(
                # Disjoint output blocks, read-only table -> safe to shard
                # across v7x's two TensorCores; no-op on single-TC chips.
                dimension_semantics=("parallel",),
            ),
            cost_estimate=cost,
        )(idx_p, table_p)
    else:
        raise ValueError(f"unknown method: {method}")

    return out[:m, :out_dim].reshape(*orig_shape, out_dim)


def xavier_uniform(key, shape, dtype=jnp.float32):
    # torch.nn.init.xavier_uniform_ for a 2-D weight [fan_out, fan_in]
    fan_out, fan_in = shape
    bound = (6.0 / (fan_in + fan_out)) ** 0.5
    return jax.random.uniform(key, shape, dtype, minval=-bound, maxval=bound)


class EmbeddingPallas:
    """JAX/Pallas port of Embedding.forward.

    forward(ht_idx, qual_idx):
      ht_idx:   int32 [B, N, 2]                  (entity ids for head/tail)
      qual_idx: int32 [B, N, max_seq_length - 3] (alternating rel/ent ids;
                                                  odd abs-position -> rel id,
                                                  even abs-position -> ent id)
    returns (h_t_emb, qual_rel_emb, qual_ent_emb)
    """

    def __init__(self, num_ent, num_rel, embed_dim, max_seq_length, key):
        self.es = embed_dim
        self.max_seq_length = max_seq_length
        self.num_ent = num_ent
        self.num_rel = num_rel
        k_rel, k_ent = jax.random.split(key)
        # Matches the PyTorch path with use_pretrain == 0: xavier_uniform_
        # overwrites the padding_idx row too, so no row is zeroed here.
        self.rel_embedding = xavier_uniform(k_rel, (num_rel, embed_dim))
        self.ent_embedding = xavier_uniform(k_ent, (num_ent, embed_dim))
        # Fuse both tables row-wise (entities first, relations offset by
        # num_ent) and pad ONCE here so forward calls never copy the table.
        self.fused_table = pad_table_for_lookup(
            jnp.concatenate([self.ent_embedding, self.rel_embedding], axis=0))

    def __call__(self, ht_idx, qual_idx):
        qual_rel = qual_idx[:, :, ::2]     # abs positions 3,5,...  (relation ids)
        qual_ent = qual_idx[:, :, 1::2]    # abs positions 4,6,...  (entity ids)

        n_ht = ht_idx.size
        n_qe = qual_ent.size
        # All three lookups fused into a single pallas_call (launch + pipeline
        # fill/drain paid once); relation ids are offset into the fused table.
        fused_idx = jnp.concatenate([
            ht_idx.reshape(-1),
            qual_ent.reshape(-1),
            qual_rel.reshape(-1) + self.num_ent,
        ]).astype(jnp.int32)
        emb = embedding_lookup(self.fused_table, fused_idx, out_dim=self.es)

        h_t_emb = emb[:n_ht].reshape(*ht_idx.shape, self.es)
        qual_ent_emb = emb[n_ht:n_ht + n_qe].reshape(*qual_ent.shape, self.es)
        qual_rel_emb = emb[n_ht + n_qe:].reshape(*qual_rel.shape, self.es)
        return h_t_emb, qual_rel_emb, qual_ent_emb


if __name__ == "__main__":
    key = jax.random.PRNGKey(0)
    k_model, k_ht, k_qr, k_qe = jax.random.split(key, 4)

    # Small synthetic configuration consistent with the module's __init__.
    num_ent = 64
    num_rel = 16
    embed_dim = 32
    max_seq_length = 7            # -> qualifier slots = positions 3,4,5,6
    B, N = 2, 3                   # batch of 2, 3 tuples per batch element

    model = EmbeddingPallas(num_ent, num_rel, embed_dim, max_seq_length, k_model)

    q = max_seq_length - 3        # 4 qualifier slots
    ht_idx = jax.random.randint(k_ht, (B, N, 2), 0, num_ent, dtype=jnp.int32)
    rel_ids = jax.random.randint(k_qr, (B, N, (q + 1) // 2), 0, num_rel, dtype=jnp.int32)
    ent_ids = jax.random.randint(k_qe, (B, N, q // 2), 0, num_ent, dtype=jnp.int32)
    qual_idx = jnp.zeros((B, N, q), dtype=jnp.int32)
    qual_idx = qual_idx.at[:, :, ::2].set(rel_ids)
    qual_idx = qual_idx.at[:, :, 1::2].set(ent_ids)

    h_t_emb, qual_rel_emb, qual_ent_emb = model(ht_idx, qual_idx)
    jax.block_until_ready((h_t_emb, qual_rel_emb, qual_ent_emb))

    # Reference check against plain JAX gathers (fused MXU one-hot path).
    ref_ht = jnp.take(model.ent_embedding, ht_idx, axis=0)
    ref_qr = jnp.take(model.rel_embedding, qual_idx[:, :, ::2], axis=0)
    ref_qe = jnp.take(model.ent_embedding, qual_idx[:, :, 1::2], axis=0)
    assert h_t_emb.shape == (B, N, 2, embed_dim)
    assert qual_rel_emb.shape == (B, N, (q + 1) // 2, embed_dim)
    assert qual_ent_emb.shape == (B, N, q // 2, embed_dim)
    assert jnp.allclose(h_t_emb, ref_ht, atol=1e-6)
    assert jnp.allclose(qual_rel_emb, ref_qr, atol=1e-6)
    assert jnp.allclose(qual_ent_emb, ref_qe, atol=1e-6)

    # Also exercise the large-table DMA row-gather path on the same data.
    ht_gather = embedding_lookup(model.ent_embedding, ht_idx, method="gather")
    jax.block_until_ready(ht_gather)
    assert jnp.allclose(ht_gather, ref_ht, atol=1e-6)

    print("KERNEL_OK")
</pallas_src>

<mosaic_0001>
module attributes {stable_mosaic.version = 11 : i64} {
  func.func @_onehot_matmul_kernel(%arg0: i32, %arg1: memref<40x1xi32, #tpu.memory_space<vmem>>, %arg2: memref<80x128xf32, #tpu.memory_space<vmem>>, %arg3: memref<40x128xf32, #tpu.memory_space<vmem>>) attributes {dimension_semantics = [#tpu.dimension_semantics<parallel>], iteration_bounds = array<i64: 1>, scalar_prefetch = 0 : i64, scratch_operands = 0 : i64, tpu.core_type = #tpu.core_type<tc>, window_params = [{transform_indices = @transform_0, window_bounds = array<i64: 40, 1>}, {pipeline_mode = #tpu.pipeline_mode<synchronous>, transform_indices = @transform_1, window_bounds = array<i64: 80, 128>}, {transform_indices = @transform_2, window_bounds = array<i64: 40, 128>}]} {
    %c0 = arith.constant 0 : index
    %c0_0 = arith.constant 0 : index
    %0 = vector.load %arg1[%c0, %c0_0] : memref<40x1xi32, #tpu.memory_space<vmem>>, vector<40x1xi32>
    %1 = tpu.iota {dimensions = array<i32: 1>} : vector<40x80xi32>
    %cst = arith.constant 0.000000e+00 : f32
    %2 = vector.broadcast %cst : f32 to vector<40x128xf32>
    %c0_1 = arith.constant 0 : index
    %c0_2 = arith.constant 0 : index
    %3 = vector.load %arg2[%c0_1, %c0_2] : memref<80x128xf32, #tpu.memory_space<vmem>>, vector<80x128xf32>
    %c0_i32 = arith.constant 0 : i32
    %4 = vector.broadcast %c0_i32 : i32 to vector<40x1xi32>
    %5 = arith.subi %0, %4 : vector<40x1xi32>
    %6 = vector.broadcast %5 : vector<40x1xi32> to vector<40x80xi32>
    %7 = arith.cmpi eq, %1, %6 : vector<40x80xi32>
    %8 = arith.extui %7 : vector<40x80xi1> to vector<40x80xi32>
    %9 = arith.sitofp %8 : vector<40x80xi32> to vector<40x80xf32>
    %cst_3 = arith.constant dense<0.000000e+00> : vector<40x128xf32>
    %10 = tpu.matmul %9, %3, %cst_3 {dimension_numbers = #tpu.dot_dimension_numbers<[1], [0], [0], [1], [0, 0, 1, 1], [], []>} : vector<40x80xf32>, vector<80x128xf32>, vector<40x128xf32> -> vector<40x128xf32>
    %11 = arith.addf %2, %10 : vector<40x128xf32>
    %c0_4 = arith.constant 0 : index
    %c0_5 = arith.constant 0 : index
    %12 = vector.load %arg3[%c0_4, %c0_5] : memref<40x128xf32, #tpu.memory_space<vmem>>, vector<40x128xf32>
    tpu.vector_store %arg3[%c0_4, %c0_5], %11 {strides = array<i32>} : memref<40x128xf32, #tpu.memory_space<vmem>>, vector<40x128xf32>,
    return
  }
  func.func @transform_0(%arg0: i32) -> (i32, i32) {
    %c0_i32 = arith.constant 0 : i32
    %c0_i32_0 = arith.constant 0 : i32
    return %arg0, %c0_i32 : i32, i32
  }
  func.func @transform_1(%arg0: i32) -> (i32, i32) {
    %c0_i32 = arith.constant 0 : i32
    %c0_i32_0 = arith.constant 0 : i32
    %c0_i32_1 = arith.constant 0 : i32
    return %c0_i32, %c0_i32_0 : i32, i32
  }
  func.func @transform_2(%arg0: i32) -> (i32, i32) {
    %c0_i32 = arith.constant 0 : i32
    %c0_i32_0 = arith.constant 0 : i32
    return %arg0, %c0_i32 : i32, i32
  }
}

</mosaic_0001>

<bundles_post_ra>
// kernel: tpu_custom_call.1
= control target key start
LH: loop header
LB: loop body
LE: loop exit
PB: predicated region body
PF: predicated region fallthrough
CT: control target
= control target key end

     0   :  { %7 = vsyncpa [#allocation3], 0  ;;  %s422_s0 = inlined_call_operand.vmem [shape: s32[40,1], index: 0, kind: input, shape index: {}]   ;;  %s423_s1 = inlined_call_operand.hbm [shape: f32[80,128], index: 1, kind: input, shape index: {}]   ;;  %s424_s2 = inlined_call_operand.hbm [shape: f32[40,128], index: 2, kind: output, shape index: {}]  }
   0x1   :  { %8 = vsyncpa [#allocation4], 0  ;;  %s344_s9 = smov [#allocation2]   ;;  %s296_s13 = scalar_lea.hbm %s423_s1, 1280 }
   0x2   :  { %s16_s10 = sshll.u32 %s344_s9, 4  ;;  %p297_p0 = scmp.ne.s32.totalorder %s423_s1, %s296_s13  ;;  %s17_s10 = int_to_ptr.vmem [resolvable:$true] %s16_s10 }
   0x3   :  { %p300_p1 = scmp.lt.u32.totalorder %s296_s13, %s423_s1 }
   0x5   :  { %p302_p2 = pnand %p300_p1, %p297_p0 }
   0x7   :  { %305 = shalt.err (!%p302_p2)
}
   0x8   :  { %s306_s18 = scalar_lea.vmem %s17_s10, 1280  ;;  %p311_p4 = scmp.lt.s32.totalorder %s17_s10, %s17_s10 }
   0x9   :  { %p307_p3 = scmp.ne.s32.totalorder %s17_s10, %s306_s18  ;;  %p312_p5 = scmp.lt.s32.totalorder %s306_s18, %s306_s18 }
   0xb   :  { %p313_p6 = por %p312_p5, %p311_p4 }
   0xd   :  { %p314_p7 = pnand %p313_p6, %p307_p3 }
   0xf   :  { %317 = shalt.err (!%p314_p7)
}
  0x10   :  { %s345_s19 = smov 128   ;;  %s346_s20 = smov 8  }
  0x11   :  { %22 = dma.hbm_to_vmem [thread:$0]  %s423_s1, 1280, %s17_s10, [#allocation3], %s345_s19, %s345_s19, %s346_s20  }
  0x12   :  { %340 = dma.done.wait [#allocation3], 1280  }
  0x13   :  { %341 = vsyncadd [#allocation3], 4294966016  ;;  %v347_v0 = vmov 0   ;;  %v348_v1 = vmov 0.0|0.0   ;;  %v29_v2 = vld [vmem:[%s422_s0 + $0x18] sm:$0xff]  ;;  %v26_v3 = vld [vmem:[%s422_s0] sm:$0xff]  ;;  %v31_v23 = vlaneseq }
  0x14   :  { %295 = vset.pattern.permute.xlu1 %v347_v0  ;;  %294 = vset.pattern.permute.xlu0 %v347_v0  ;;  %v33_v4 = vld [vmem:[#allocation2] sm:$0xff]  ;;  %v28_v5 = vld [vmem:[%s422_s0 + $0x10] sm:$0xff]  ;;  %v27_v6 = vld [vmem:[%s422_s0 + $0x8] sm:$0xff]  ;;  %vm349_vm0 = vmmov 0   ;;  %v350_v8 = vmov 0.0   ;;  %vm73_vm1 = vcmask 654336  }
  0x15   :  { %261 = vmatprep.subr.bf16.mxu0 %v348_v1  ;;  %276 = vmatprep.subr.bf16.mxu1 %v348_v1  ;;  %v34_v7 = vld [vmem:[#allocation2 + $0x8] sm:$0xff]  ;;  %v35_v10 = vld [vmem:[#allocation2 + $0x10] sm:$0xff]  ;;  %v36_v11 = vld [vmem:[#allocation2 + $0x18] sm:$0xff]  ;;  %v32_v24 = vand.u32 127, %v31_v23 }
  0x16   :  { %53 = vperm.xlu1 %295, %v29_v2   ;;  %44 = vperm.xlu0 %294, %v26_v3   ;;  %v262_v9 = vpack.c.bf16 %v34_v7, %v33_v4  ;;  %v30_v12 = vld [vmem:[%s422_s0 + $0x20] sm:$0xff]  ;;  %v265_v13 = vpack.c.bf16 %v36_v11, %v35_v10  ;;  %v38_v15 = vld [vmem:[#allocation2 + $0x28] sm:$0xff]  ;;  %v39_v17 = vld [vmem:[#allocation2 + $0x30] sm:$0xff]  ;;  %s351_s0 = smov [#allocation5]  }
  0x17   :  { %246 = vmatprep.mubr.msk.f32.mxu0 %vm349_vm0, %v350_v8  ;;  %255 = vmatprep.mubr.msk.f32.mxu1 %vm349_vm0, %v350_v8  ;;  %v37_v14 = vld [vmem:[#allocation2 + $0x20] sm:$0xff]  ;;  %v40_v18 = vld [vmem:[#allocation2 + $0x38] sm:$0xff]  ;;  %v42_v21 = vld [vmem:[#allocation2 + $0x48] sm:$0xff]  ;;  %s189_s4 = sshll.u32 %s351_s0, 4  ;;  %s190_s4 = int_to_ptr.vmem [resolvable:$true] %s189_s4 }
  0x18   :  { %263 = vmatpush3.bf16.msra.mxu0 %v262_v9  ;;  %281 = vmatpush3.bf16.msra.mxu1 %v262_v9  ;;  %v268_v16 = vpack.c.bf16 %v38_v15, %v37_v14  ;;  %v271_v19 = vpack.c.bf16 %v40_v18, %v39_v17  ;;  %v41_v20 = vld [vmem:[#allocation2 + $0x40] sm:$0xff]  ;;  %s318_s5 = scalar_lea.vmem %s190_s4, 640  ;;  %p323_p9 = scmp.lt.s32.totalorder %s190_s4, %s190_s4 }
  0x19   :  { %264 = vmatprep.subr.bf16.mxu0 %v348_v1  ;;  %277 = vmatprep.subr.bf16.mxu1 %v348_v1  ;;  %v274_v22 = vpack.c.bf16 %v42_v21, %v41_v20  ;;  %p319_p8 = scmp.ne.s32.totalorder %s190_s4, %s318_s5  ;;  %p324_p10 = scmp.lt.s32.totalorder %s318_s5, %s318_s5 }
  0x1a   :  { %50 = vperm.xlu1 %295, %v28_v5   ;;  %47 = vperm.xlu0 %294, %v27_v6  }
  0x1b   :  { %p325_p11 = por %p324_p10, %p323_p9 }
  0x1c   :  { %266 = vmatpush3.bf16.msra.mxu0 %v265_v13  ;;  %282 = vmatpush3.bf16.msra.mxu1 %v265_v13 }
  0x1d   :  { %267 = vmatprep.subr.bf16.mxu0 %v348_v1  ;;  %278 = vmatprep.subr.bf16.mxu1 %v348_v1  ;;  %p326_p12 = pnand %p325_p11, %p319_p8 }
  0x1e   :  { %56 = vperm.xlu0 %294, %v30_v12  }
  0x20   :  { %269 = vmatpush3.bf16.msra.mxu0 %v268_v16  ;;  %283 = vmatpush3.bf16.msra.mxu1 %v268_v16 }
  0x21   :  { %270 = vmatprep.subr.bf16.mxu0 %v348_v1  ;;  %279 = vmatprep.subr.bf16.mxu1 %v348_v1 }
  0x24   :  { %272 = vmatpush3.bf16.msra.mxu0 %v271_v19  ;;  %284 = vmatpush3.bf16.msra.mxu1 %v271_v19 }
  0x25   :  { %273 = vmatprep.subr.bf16.mxu0 %v348_v1  ;;  %280 = vmatprep.subr.bf16.mxu1 %v348_v1 }
  0x28   :  { %275 = vmatpush3.bf16.msra.mxu0 %v274_v22  ;;  %285 = vmatpush3.bf16.msra.mxu1 %v274_v22 }
  0x95   :  { %v54_v25 = vpop.permute.xlu1 %53  ;;  %v45_v26 = vpop.permute.xlu0 %44 }
  0x96   :  { %vm61_vm2 = vcmp.eq.s32.totalorder %v32_v24, %v54_v25  ;;  %vm58_vm3 = vcmp.eq.s32.totalorder %v32_v24, %v45_v26 }
  0x97   :  { %v204_v27 = vsel %vm61_vm2, 1.0, %v350_v8  ;;  %v201_v28 = vsel %vm58_vm3, 1.0, %v350_v8 }
  0x98   :  { %247 = vmatmul.mubr.msk.f32.vlgmr.msra.gmra.mrb[0].mxu0 %vm73_vm1, %v201_v28  ;;  %256 = vmatmul.mubr.msk.f32.vlgmr.msra.gmra.mrb[0].mxu1 %vm73_vm1, %v204_v27 }
  0x99   :  { %v51_v29 = vpop.permute.xlu1 %50  ;;  %v48_v30 = vpop.permute.xlu0 %47  ;;  %249 = vmatprep.mubr.msk.f32.mxu0 %vm349_vm0, %v350_v8  ;;  %258 = vmatprep.mubr.msk.f32.mxu1 %vm349_vm0, %v350_v8 }
  0x9a   :  { %vm59_vm4 = vcmp.eq.s32.totalorder %v32_v24, %v48_v30  ;;  %vm60_vm5 = vcmp.eq.s32.totalorder %v32_v24, %v51_v29 }
  0x9b   :  { %v202_v31 = vsel %vm59_vm4, 1.0, %v350_v8  ;;  %v203_v33 = vsel %vm60_vm5, 1.0, %v350_v8 }
  0x9c   :  { %250 = vmatmul.mubr.msk.f32.gmra.mrb[2].mxu0 %vm73_vm1, %v202_v31 }
  0x9d   :  { %v57_v32 = vpop.permute.xlu0 %56  ;;  %252 = vmatprep.mubr.msk.f32.mxu0 %vm349_vm0, %v350_v8 }
  0x9e   :  { %vm62_vm6 = vcmp.eq.s32.totalorder %v32_v24, %v57_v32 }
  0x9f   :  { %v205_v34 = vsel %vm62_vm6, 1.0, %v350_v8 }
  0xa0   :  { %253 = vmatmul.mubr.msk.f32.gmra.mrb[4].mxu0 %vm73_vm1, %v203_v33  ;;  %259 = vmatmul.mubr.msk.f32.gmra.mrb[2].mxu1 %vm73_vm1, %v205_v34 }
 0x16b   :  { %v155_v35 = vpop.f32.mrb[0].mxu0  ;;  %v170_v36 = vpop.f32.mrb[0].mxu1 }
 0x16c   :  { %179 = vst [vmem:[#allocation5] sm:$0xff] %v155_v35  ;;  %v248_v37 = vpop.f32.mrb[1].mxu0  ;;  %182 = vst [vmem:[#allocation5 + $0x18] sm:$0xff] %v170_v36  ;;  %v257_v38 = vpop.f32.mrb[1].mxu1 }
 0x16f   :  { %v160_v39 = vpop.f32.mrb[2].mxu0 }
 0x170   :  { %180 = vst [vmem:[#allocation5 + $0x8] sm:$0xff] %v160_v39  ;;  %v251_v40 = vpop.f32.mrb[3].mxu0 }
 0x173   :  { %v165_v41 = vpop.f32.mrb[4].mxu0  ;;  %v175_v42 = vpop.f32.mrb[2].mxu1 }
 0x174   :  { %181 = vst [vmem:[#allocation5 + $0x10] sm:$0xff] %v165_v41  ;;  %183 = vst [vmem:[#allocation5 + $0x20] sm:$0xff] %v175_v42  ;;  %v254_v43 = vpop.f32.mrb[5].mxu0  ;;  %v260_v44 = vpop.f32.mrb[3].mxu1 }
 0x175   :  { %329 = shalt.err (!%p326_p12)
}
 0x176   :  { %s330_s8 = scalar_lea.hbm %s424_s2, 640 }
 0x177   :  { %p331_p13 = scmp.ne.s32.totalorder %s424_s2, %s330_s8  ;;  %p334_p0 = scmp.lt.u32.totalorder %s330_s8, %s424_s2 }
 0x179   :  { %p336_p1 = pnand %p334_p0, %p331_p13 }
 0x17b   :  { %339 = shalt.err (!%p336_p1)
}
 0x17c   :  { %195 = dma.vmem_to_hbm [thread:$0]  %s190_s4, 640, %s424_s2, [#allocation4], %s345_s19, %s345_s19, %s346_s20  }
 0x17d   :  { %342 = dma.done.wait [#allocation4], 640  }
 0x17e   :  { %343 = vsyncadd [#allocation4], 4294966656 }
 0x17f   :  { %199 = vsyncpa [#allocation3], 1 }
 0x180   :  { %200 = vsyncpa [#allocation4], 1 }

</bundles_post_ra>
